<compile_context>
chip_gen: v7x
topology: tpu7x:2x2x1
jax: 0.10.0
libtpu: 0.0.40
codegen_flags: <defaults>
</compile_context>

<pallas_src>
import jax
import jax.numpy as jnp
from jax.experimental import pallas as pl
from jax.experimental.pallas import tpu as pltpu


IN_FEATURES = 15
HIDDEN = 28
OUT_FEATURES = 7


def _round_up(n, m):
    return ((n + m - 1) // m) * m


def _sigmoid(h):
    # Exact identity sigmoid(x) = 0.5 * (tanh(x/2) + 1): one EUP op per
    # element instead of exp + reciprocal (this kernel is EUP-bound).
    return 0.5 * (jnp.tanh(0.5 * h) + 1.0)


def _make_kernel(act_dtype):
    def kernel(x_ref, w0_ref, b0_ref, w1_ref, b1_ref, w2_ref, b2_ref, o_ref):
        """One batch tile, batch on the 128-lane axis.

        x_ref : (TB, 15) f32   natural layout (no wrapper transpose)
        w0_ref: (28, 15) bf16  b0_ref: (28, 1) f32
        w1_ref: (28, 28) bf16  b1_ref: (28, 1) f32
        w2_ref: (7, 28)  bf16  b2_ref: (7, 1)  f32
        o_ref : (7, TB)  f32   softmax probabilities per column
        """
        x = x_ref[...].astype(jnp.bfloat16)                       # (TB, 15)

        # Layer 0: contract the 15-feature axis of BOTH operands:
        #   (28,15) . (TB,15)^T -> (28, TB); f32 accumulation on the MXU.
        h = jax.lax.dot_general(
            w0_ref[...], x, (((1,), (1,)), ((), ())),
            preferred_element_type=jnp.float32) + b0_ref[...]
        h = _sigmoid(h.astype(act_dtype))

        # Layer 1: (28,28) @ (28,TB) -> (28,TB)
        h = jnp.dot(w1_ref[...], h.astype(jnp.bfloat16),
                    preferred_element_type=jnp.float32) + b1_ref[...]
        h = _sigmoid(h.astype(act_dtype))

        # Layer 2: (7,28) @ (28,TB) -> (7,TB)
        h = jnp.dot(w2_ref[...], h.astype(jnp.bfloat16),
                    preferred_element_type=jnp.float32) + b2_ref[...]
        h = _sigmoid(h.astype(act_dtype))                         # in (0, 1)

        # Softmax over features (axis 0 here == PyTorch dim=1 of (B, 7)).
        # Max-subtraction is skipped ON PURPOSE: the preceding sigmoid bounds
        # the inputs to (0, 1), so exp() cannot overflow.  Keep that invariant
        # if the activation ever changes.
        h = h.astype(jnp.float32)
        e = jnp.exp(h)
        denom = jnp.sum(e, axis=0, keepdims=True)
        # Exact division (NOT approx reciprocal) so every probability column
        # sums to 1 within f32 roundoff.
        o_ref[...] = e / denom

    return kernel


def genre_classification_forward(x, params, *, tile_b=16384,
                                 activation_dtype=jnp.float32):
    """x: (B, 15) float32 -> (B, 7) float32 softmax probabilities.

    tile_b: lanes per grid step (rounded to a multiple of 128).  16384 is a
      safe default for v7x's 64 MiB VMEM; v5e/v6e can pass 32768+.
    activation_dtype: jnp.bfloat16 on v6e/v7x halves the binding EUP cost
      (do NOT use on v5e — no bf16 VPU/EUP path there).
    """
    w0, b0, w1, b1, w2, b2 = params
    B = x.shape[0]
    x = x.astype(jnp.float32)

    # Lane-dense batch tiling: tile must be a multiple of 128 lanes.
    tb = _round_up(min(tile_b, _round_up(B, 128)), 128)
    b_pad = _round_up(B, tb)
    if b_pad != B:
        x = jnp.pad(x, ((0, b_pad - B), (0, 0)))
    grid = (b_pad // tb,)

    # Pre-cast weights to bf16 once: they are VMEM-resident across the grid,
    # so this removes a per-step VPU cast and halves the one-time weight DMA.
    # Biases stay f32 (added to the f32 MXU accumulation).
    w0b, w1b, w2b = (w.astype(jnp.bfloat16) for w in (w0, w1, w2))

    def resident(a):  # weights/biases: one block, DMA'd once, VMEM-resident
        return pl.BlockSpec(a.shape, lambda i: (0, 0))

    # Explicit VMEM budget derived from the per-lane working set (double-
    # buffered x/out tiles + in-kernel intermediates), capped well under
    # v7x's 64 MiB physical VMEM.
    per_lane_bytes = (2 * IN_FEATURES * 4        # double-buffered x tile
                      + 2 * OUT_FEATURES * 4     # double-buffered out tile
                      + 6 * HIDDEN * 4)          # generous intermediate slab
    vmem_bytes = int(min(48 * 1024 * 1024,
                         max(16 * 1024 * 1024, 2 * per_lane_bytes * tb)))

    cost = pl.CostEstimate(
        flops=2 * b_pad * (IN_FEATURES * HIDDEN + HIDDEN * HIDDEN
                           + HIDDEN * OUT_FEATURES),
        transcendentals=b_pad * (2 * HIDDEN + 2 * OUT_FEATURES),
        bytes_accessed=(x.size * 4 + b_pad * OUT_FEATURES * 4
                        + sum(a.size * 2 for a in (w0b, w1b, w2b))
                        + sum(a.size * 4 for a in (b0, b1, b2))),
    )

    out_t = pl.pallas_call(
        _make_kernel(activation_dtype),
        out_shape=jax.ShapeDtypeStruct((OUT_FEATURES, b_pad), jnp.float32),
        grid=grid,
        in_specs=[
            pl.BlockSpec((tb, IN_FEATURES), lambda i: (i, 0)),  # natural layout
            resident(w0b), resident(b0),
            resident(w1b), resident(b1),
            resident(w2b), resident(b2),
        ],
        out_specs=pl.BlockSpec((OUT_FEATURES, tb), lambda i: (0, i)),
        compiler_params=pltpu.CompilerParams(
            dimension_semantics=("parallel",),
            vmem_limit_bytes=vmem_bytes,
        ),
        cost_estimate=cost,
    )(x, w0b, b0, w1b, b1, w2b, b2)

    # Padded batch columns carry garbage probabilities; slice them off before
    # returning in the PyTorch (B, 7) layout.  Drop the .T if a (7, B)
    # consumer layout is acceptable downstream.
    return out_t[:, :B].T


def init_params(key):
    """Deterministic synthetic parameters in PyTorch nn.Linear layout:
    weight (out_features, in_features); bias stored as (out_features, 1) so it
    broadcasts along the lane (batch) axis inside the kernel."""
    k0, k1, k2, k3, k4, k5 = jax.random.split(key, 6)
    w0 = jax.random.normal(k0, (HIDDEN, IN_FEATURES), jnp.float32) * 0.1
    b0 = jax.random.normal(k1, (HIDDEN, 1), jnp.float32) * 0.1
    w1 = jax.random.normal(k2, (HIDDEN, HIDDEN), jnp.float32) * 0.1
    b1 = jax.random.normal(k3, (HIDDEN, 1), jnp.float32) * 0.1
    w2 = jax.random.normal(k4, (OUT_FEATURES, HIDDEN), jnp.float32) * 0.1
    b2 = jax.random.normal(k5, (OUT_FEATURES, 1), jnp.float32) * 0.1
    return (w0, b0, w1, b1, w2, b2)


def reference_forward(x, params):
    """Pure-JAX f32 reference (matches the PyTorch forward exactly)."""
    w0, b0, w1, b1, w2, b2 = params
    h = jax.nn.sigmoid(x @ w0.T + b0.T)
    h = jax.nn.sigmoid(h @ w1.T + b1.T)
    h = jax.nn.sigmoid(h @ w2.T + b2.T)
    return jax.nn.softmax(h, axis=1)


if __name__ == "__main__":
    key = jax.random.PRNGKey(0)
    kx, kp = jax.random.split(key)

    # batch=8 samples of the 15 binary game-feature flags
    x = (jax.random.uniform(kx, (8, IN_FEATURES)) > 0.5).astype(jnp.float32)
    params = init_params(kp)

    out = jax.block_until_ready(genre_classification_forward(x, params))
    ref = reference_forward(x, params)

    assert out.shape == (8, OUT_FEATURES)
    # bf16 MXU operands -> small, bounded deviation from the f32 reference.
    assert jnp.allclose(out, ref, atol=5e-3, rtol=0), "mismatch vs f32 reference"
    # Exact softmax division -> rows sum to 1 within f32 roundoff.
    assert jnp.allclose(jnp.sum(out, axis=1), 1.0, atol=1e-5), \
        "softmax rows must sum to 1"

    print("KERNEL_OK")
</pallas_src>

<mosaic_0001>
module attributes {stable_mosaic.version = 11 : i64} {
  func.func @kernel(%arg0: i32, %arg1: memref<128x15xf32, #tpu.memory_space<vmem>>, %arg2: memref<28x15xbf16, #tpu.memory_space<vmem>>, %arg3: memref<28x1xf32, #tpu.memory_space<vmem>>, %arg4: memref<28x28xbf16, #tpu.memory_space<vmem>>, %arg5: memref<28x1xf32, #tpu.memory_space<vmem>>, %arg6: memref<7x28xbf16, #tpu.memory_space<vmem>>, %arg7: memref<7x1xf32, #tpu.memory_space<vmem>>, %arg8: memref<7x128xf32, #tpu.memory_space<vmem>>) attributes {dimension_semantics = [#tpu.dimension_semantics<parallel>], iteration_bounds = array<i64: 1>, scalar_prefetch = 0 : i64, scratch_operands = 0 : i64, tpu.core_type = #tpu.core_type<tc>, window_params = [{transform_indices = @transform_0, window_bounds = array<i64: 128, 15>}, {pipeline_mode = #tpu.pipeline_mode<synchronous>, transform_indices = @transform_1, window_bounds = array<i64: 28, 15>}, {pipeline_mode = #tpu.pipeline_mode<synchronous>, transform_indices = @transform_2, window_bounds = array<i64: 28, 1>}, {pipeline_mode = #tpu.pipeline_mode<synchronous>, transform_indices = @transform_3, window_bounds = array<i64: 28, 28>}, {pipeline_mode = #tpu.pipeline_mode<synchronous>, transform_indices = @transform_4, window_bounds = array<i64: 28, 1>}, {pipeline_mode = #tpu.pipeline_mode<synchronous>, transform_indices = @transform_5, window_bounds = array<i64: 7, 28>}, {pipeline_mode = #tpu.pipeline_mode<synchronous>, transform_indices = @transform_6, window_bounds = array<i64: 7, 1>}, {transform_indices = @transform_7, window_bounds = array<i64: 7, 128>}]} {
    %c0 = arith.constant 0 : index
    %c0_0 = arith.constant 0 : index
    %0 = vector.load %arg1[%c0, %c0_0] : memref<128x15xf32, #tpu.memory_space<vmem>>, vector<128x15xf32>
    %1 = arith.truncf %0 : vector<128x15xf32> to vector<128x15xbf16>
    %c0_1 = arith.constant 0 : index
    %c0_2 = arith.constant 0 : index
    %2 = vector.load %arg2[%c0_1, %c0_2] : memref<28x15xbf16, #tpu.memory_space<vmem>>, vector<28x15xbf16>
    %cst = arith.constant dense<0.000000e+00> : vector<28x128xf32>
    %3 = tpu.matmul %2, %1, %cst {dimension_numbers = #tpu.dot_dimension_numbers<[1], [1], [0], [0], [0, 0, 1, 0], [], []>} : vector<28x15xbf16>, vector<128x15xbf16>, vector<28x128xf32> -> vector<28x128xf32>
    %c0_3 = arith.constant 0 : index
    %c0_4 = arith.constant 0 : index
    %4 = vector.load %arg3[%c0_3, %c0_4] : memref<28x1xf32, #tpu.memory_space<vmem>>, vector<28x1xf32>
    %5 = vector.broadcast %4 : vector<28x1xf32> to vector<28x128xf32>
    %6 = arith.addf %3, %5 : vector<28x128xf32>
    %cst_5 = arith.constant 5.000000e-01 : f32
    %7 = vector.broadcast %cst_5 : f32 to vector<28x128xf32>
    %8 = arith.mulf %7, %6 : vector<28x128xf32>
    %9 = math.tanh %8 : vector<28x128xf32>
    %cst_6 = arith.constant 1.000000e+00 : f32
    %10 = vector.broadcast %cst_6 : f32 to vector<28x128xf32>
    %11 = arith.addf %9, %10 : vector<28x128xf32>
    %cst_7 = arith.constant 5.000000e-01 : f32
    %12 = vector.broadcast %cst_7 : f32 to vector<28x128xf32>
    %13 = arith.mulf %12, %11 : vector<28x128xf32>
    %c0_8 = arith.constant 0 : index
    %c0_9 = arith.constant 0 : index
    %14 = vector.load %arg4[%c0_8, %c0_9] : memref<28x28xbf16, #tpu.memory_space<vmem>>, vector<28x28xbf16>
    %15 = arith.truncf %13 : vector<28x128xf32> to vector<28x128xbf16>
    %cst_10 = arith.constant dense<0.000000e+00> : vector<28x128xf32>
    %16 = tpu.matmul %14, %15, %cst_10 {dimension_numbers = #tpu.dot_dimension_numbers<[1], [0], [0], [1], [0, 0, 1, 1], [], []>} : vector<28x28xbf16>, vector<28x128xbf16>, vector<28x128xf32> -> vector<28x128xf32>
    %c0_11 = arith.constant 0 : index
    %c0_12 = arith.constant 0 : index
    %17 = vector.load %arg5[%c0_11, %c0_12] : memref<28x1xf32, #tpu.memory_space<vmem>>, vector<28x1xf32>
    %18 = vector.broadcast %17 : vector<28x1xf32> to vector<28x128xf32>
    %19 = arith.addf %16, %18 : vector<28x128xf32>
    %cst_13 = arith.constant 5.000000e-01 : f32
    %20 = vector.broadcast %cst_13 : f32 to vector<28x128xf32>
    %21 = arith.mulf %20, %19 : vector<28x128xf32>
    %22 = math.tanh %21 : vector<28x128xf32>
    %cst_14 = arith.constant 1.000000e+00 : f32
    %23 = vector.broadcast %cst_14 : f32 to vector<28x128xf32>
    %24 = arith.addf %22, %23 : vector<28x128xf32>
    %cst_15 = arith.constant 5.000000e-01 : f32
    %25 = vector.broadcast %cst_15 : f32 to vector<28x128xf32>
    %26 = arith.mulf %25, %24 : vector<28x128xf32>
    %c0_16 = arith.constant 0 : index
    %c0_17 = arith.constant 0 : index
    %27 = vector.load %arg6[%c0_16, %c0_17] : memref<7x28xbf16, #tpu.memory_space<vmem>>, vector<7x28xbf16>
    %28 = arith.truncf %26 : vector<28x128xf32> to vector<28x128xbf16>
    %cst_18 = arith.constant dense<0.000000e+00> : vector<7x128xf32>
    %29 = tpu.matmul %27, %28, %cst_18 {dimension_numbers = #tpu.dot_dimension_numbers<[1], [0], [0], [1], [0, 0, 1, 1], [], []>} : vector<7x28xbf16>, vector<28x128xbf16>, vector<7x128xf32> -> vector<7x128xf32>
    %c0_19 = arith.constant 0 : index
    %c0_20 = arith.constant 0 : index
    %30 = vector.load %arg7[%c0_19, %c0_20] : memref<7x1xf32, #tpu.memory_space<vmem>>, vector<7x1xf32>
    %31 = vector.broadcast %30 : vector<7x1xf32> to vector<7x128xf32>
    %32 = arith.addf %29, %31 : vector<7x128xf32>
    %cst_21 = arith.constant 5.000000e-01 : f32
    %33 = vector.broadcast %cst_21 : f32 to vector<7x128xf32>
    %34 = arith.mulf %33, %32 : vector<7x128xf32>
    %35 = math.tanh %34 : vector<7x128xf32>
    %cst_22 = arith.constant 1.000000e+00 : f32
    %36 = vector.broadcast %cst_22 : f32 to vector<7x128xf32>
    %37 = arith.addf %35, %36 : vector<7x128xf32>
    %cst_23 = arith.constant 5.000000e-01 : f32
    %38 = vector.broadcast %cst_23 : f32 to vector<7x128xf32>
    %39 = arith.mulf %38, %37 : vector<7x128xf32>
    %40 = math.exp %39 : vector<7x128xf32>
    %cst_24 = arith.constant dense<0.000000e+00> : vector<128xf32>
    %41 = vector.multi_reduction <add>, %40, %cst_24 [0] : vector<7x128xf32> to vector<128xf32>
    %42 = vector.shape_cast %41 : vector<128xf32> to vector<1x128xf32>
    %43 = vector.broadcast %42 : vector<1x128xf32> to vector<7x128xf32>
    %44 = arith.divf %40, %43 : vector<7x128xf32>
    %c0_25 = arith.constant 0 : index
    %c0_26 = arith.constant 0 : index
    %45 = vector.load %arg8[%c0_25, %c0_26] : memref<7x128xf32, #tpu.memory_space<vmem>>, vector<7x128xf32>
    tpu.vector_store %arg8[%c0_25, %c0_26], %44 {strides = array<i32>} : memref<7x128xf32, #tpu.memory_space<vmem>>, vector<7x128xf32>,
    return
  }
  func.func @transform_0(%arg0: i32) -> (i32, i32) {
    %c0_i32 = arith.constant 0 : i32
    %c0_i32_0 = arith.constant 0 : i32
    return %arg0, %c0_i32 : i32, i32
  }
  func.func @transform_1(%arg0: i32) -> (i32, i32) {
    %c0_i32 = arith.constant 0 : i32
    %c0_i32_0 = arith.constant 0 : i32
    %c0_i32_1 = arith.constant 0 : i32
    return %c0_i32, %c0_i32_0 : i32, i32
  }
  func.func @transform_2(%arg0: i32) -> (i32, i32) {
    %c0_i32 = arith.constant 0 : i32
    %c0_i32_0 = arith.constant 0 : i32
    %c0_i32_1 = arith.constant 0 : i32
    return %c0_i32, %c0_i32_0 : i32, i32
  }
  func.func @transform_3(%arg0: i32) -> (i32, i32) {
    %c0_i32 = arith.constant 0 : i32
    %c0_i32_0 = arith.constant 0 : i32
    %c0_i32_1 = arith.constant 0 : i32
    return %c0_i32, %c0_i32_0 : i32, i32
  }
  func.func @transform_4(%arg0: i32) -> (i32, i32) {
    %c0_i32 = arith.constant 0 : i32
    %c0_i32_0 = arith.constant 0 : i32
    %c0_i32_1 = arith.constant 0 : i32
    return %c0_i32, %c0_i32_0 : i32, i32
  }
  func.func @transform_5(%arg0: i32) -> (i32, i32) {
    %c0_i32 = arith.constant 0 : i32
    %c0_i32_0 = arith.constant 0 : i32
    %c0_i32_1 = arith.constant 0 : i32
    return %c0_i32, %c0_i32_0 : i32, i32
  }
  func.func @transform_6(%arg0: i32) -> (i32, i32) {
    %c0_i32 = arith.constant 0 : i32
    %c0_i32_0 = arith.constant 0 : i32
    %c0_i32_1 = arith.constant 0 : i32
    return %c0_i32, %c0_i32_0 : i32, i32
  }
  func.func @transform_7(%arg0: i32) -> (i32, i32) {
    %c0_i32 = arith.constant 0 : i32
    %c0_i32_0 = arith.constant 0 : i32
    return %c0_i32, %arg0 : i32, i32
  }
}

</mosaic_0001>

<bundles_post_ra>
// kernel: tpu_custom_call.1
= control target key start
LH: loop header
LB: loop body
LE: loop exit
PB: predicated region body
PF: predicated region fallthrough
CT: control target
= control target key end

     0   :  { %vm90_vm0 = vcmask 121856   ;;  %v515_v5 = vmov 0   ;;  %s685_s0 = inlined_call_operand.vmem [shape: f32[128,15], index: 0, kind: input, shape index: {}]   ;;  %s686_s1 = inlined_call_operand.vmem [shape: bf16[28,15], index: 1, kind: input, shape index: {}]   ;;  %s687_s2 = inlined_call_operand.vmem [shape: f32[28,1], index: 2, kind: input, shape index: {}]   ;;  %s688_s3 = inlined_call_operand.vmem [shape: bf16[28,28], index: 3, kind: input, shape index: {}]   ;;  %s689_s4 = inlined_call_operand.vmem [shape: f32[28,1], index: 4, kind: input, shape index: {}]   ;;  %s690_s5 = inlined_call_operand.vmem [shape: bf16[7,28], index: 5, kind: input, shape index: {}]   ;;  %s691_s6 = inlined_call_operand.vmem [shape: f32[7,1], index: 6, kind: input, shape index: {}]   ;;  %s692_s7 = inlined_call_operand.hbm [shape: f32[7,128], index: 7, kind: output, shape index: {}]  }
   0x1   :  { %v28_v0 = vld [vmem:[%s685_s0] sm:$0xff]  ;;  %v29_v1 = vld [vmem:[%s685_s0 + $0x8] sm:$0xff]  ;;  %v30_v2 = vld [vmem:[%s685_s0 + $0x10] sm:$0xff]  ;;  %463 = vset.pattern.permute.xlu0 %v515_v5  ;;  %464 = vset.pattern.permute.xlu1 %v515_v5 }
   0x2   :  { %v44_v3 = vpack.c.bf16 %v29_v1, %v28_v0  ;;  %v31_v4 = vld [vmem:[%s685_s0 + $0x18] sm:$0xff]  ;;  %v32_v8 = vld [vmem:[%s685_s0 + $0x20] sm:$0xff]  ;;  %v33_v9 = vld [vmem:[%s685_s0 + $0x28] sm:$0xff] }
   0x3   :  { %v45_v6 = vpack.c.bf16 %v31_v4, %v30_v2  ;;  %v465_v10 = vld [vmem:[%s686_s1] sm:$0xff]   ;;  %v57_v12 = vld [vmem:[%s687_s2 + $0x8] sm:$0xff]  ;;  %v58_v13 = vld [vmem:[%s687_s2 + $0x10] sm:$0xff]  ;;  %v46_v15 = vpack.c.bf16 %v33_v9, %v32_v8 }
   0x4   :  { %450 = vmatprep.subr.msk.bf16.mxu0 %vm90_vm0, %v44_v3  ;;  %v98_v7 = vsel %vm90_vm0, %v44_v3, 0  ;;  %v56_v11 = vld [vmem:[%s687_s2] sm:$0xff]  ;;  %430 = vmatprep.mubr.msk.bf16.mxu0 %vm90_vm0, %v465_v10  ;;  %v59_v16 = vld [vmem:[%s687_s2 + $0x18] sm:$0xf] }
   0x5   :  { %415 = vmatpush3.bf16.xpose.msra.mxu0 %v98_v7  ;;  %62 = vperm.xlu0 %463, %v56_v11   ;;  %v101_v14 = vsel %vm90_vm0, %v45_v6, 0 }
   0x6   :  { %451 = vmatprep.subr.msk.bf16.mxu0 %vm90_vm0, %v45_v6  ;;  %72 = vperm.xlu1 %464, %v58_v13  }
   0x9   :  { %67 = vperm.xlu0 %463, %v57_v12  }
   0xa   :  { %12 = vsyncpa [#allocation3], 0  ;;  %v192_v17 = vld [vmem:[%s689_s4] sm:$0xff]  ;;  %77 = vperm.xlu1 %464, %v59_v16   ;;  %v34_v18 = vld [vmem:[%s685_s0 + $0x30] sm:$0xff]  ;;  %v104_v22 = vsel %vm90_vm0, %v46_v15, 0  ;;  %vm226_vm1 = vcmask 228352  }
   0xb   :  { %v35_v19 = vld [vmem:[%s685_s0 + $0x38] sm:$0xff]  ;;  %v193_v20 = vld [vmem:[%s689_s4 + $0x8] sm:$0xff]  ;;  %v194_v21 = vld [vmem:[%s689_s4 + $0x10] sm:$0xff]  ;;  %vm233_vm2 = vcmask 1045504   ;;  %v516_v13 = vmov 0.0   ;;  %vm517_vm3 = vmmov 0  }
   0xc   :  { %v47_v23 = vpack.c.bf16 %v35_v19, %v34_v18  ;;  %v195_v24 = vld [vmem:[%s689_s4 + $0x18] sm:$0xf]  ;;  %v305_v25 = vld [vmem:[%s691_s6] sm:$0x7f]  ;;  %v37_v27 = vld [vmem:[%s685_s0 + $0x48] sm:$0xff]  ;;  %vm363_vm4 = vcmask 1046528  }
   0xd   :  { %417 = vmatpush3.bf16.xpose.msra.mxu0 %v101_v14  ;;  %198 = vperm.xlu0 %463, %v192_v17   ;;  %v36_v26 = vld [vmem:[%s685_s0 + $0x40] sm:$0xff]  ;;  %v38_v30 = vld [vmem:[%s685_s0 + $0x50] sm:$0xff]  ;;  %v39_v31 = vld [vmem:[%s685_s0 + $0x58] sm:$0xff] }
   0xe   :  { %452 = vmatprep.subr.msk.bf16.mxu0 %vm90_vm0, %v46_v15  ;;  %203 = vperm.xlu1 %464, %v193_v20   ;;  %v107_v28 = vsel %vm90_vm0, %v47_v23, 0  ;;  %v48_v29 = vpack.c.bf16 %v37_v27, %v36_v26  ;;  %v49_v33 = vpack.c.bf16 %v39_v31, %v38_v30  ;;  %v40_v34 = vld [vmem:[%s685_s0 + $0x60] sm:$0xff]  ;;  %v41_v35 = vld [vmem:[%s685_s0 + $0x68] sm:$0xff]  ;;  %v42_v38 = vld [vmem:[%s685_s0 + $0x70] sm:$0xff] }
   0xf   :  { %v50_v37 = vpack.c.bf16 %v41_v35, %v40_v34  ;;  %v43_v39 = vld [vmem:[%s685_s0 + $0x78] sm:$0xff]  ;;  %v466_v43 = vld [vmem:[%s686_s1 + $0x8] sm:$0x3f]   ;;  %v467_v44 = vld [vmem:[%s688_s3] sm:$0xff]  }
  0x10   :  { %v110_v32 = vsel %vm90_vm0, %v48_v29, 0  ;;  %v113_v36 = vsel %vm90_vm0, %v49_v33, 0  ;;  %v51_v41 = vpack.c.bf16 %v43_v39, %v42_v38  ;;  %438 = vmatprep.mubr.msk.bf16.mxu1 %vm226_vm1, %v467_v44  ;;  %v468_v12 = vld [vmem:[%s688_s3 + $0x8] sm:$0x3f]  }
  0x11   :  { %208 = vperm.xlu0 %463, %v194_v21   ;;  %v116_v40 = vsel %vm90_vm0, %v50_v37, 0 }
  0x12   :  { %213 = vperm.xlu1 %464, %v195_v24   ;;  %v119_v42 = vsel %vm90_vm0, %v51_v41, 0 }
  0x15   :  { %419 = vmatpush3.bf16.xpose.msra.mxu0 %v104_v22  ;;  %308 = vperm.xlu0 %463, %v305_v25  }
  0x16   :  { %453 = vmatprep.subr.msk.bf16.mxu0 %vm90_vm0, %v47_v23 }
  0x1d   :  { %421 = vmatpush3.bf16.xpose.msra.mxu0 %v107_v28 }
  0x1e   :  { %454 = vmatprep.subr.msk.bf16.mxu0 %vm90_vm0, %v48_v29 }
  0x25   :  { %423 = vmatpush3.bf16.xpose.msra.mxu0 %v110_v32 }
  0x26   :  { %455 = vmatprep.subr.msk.bf16.mxu0 %vm90_vm0, %v49_v33 }
  0x2d   :  { %425 = vmatpush3.bf16.xpose.msra.mxu0 %v113_v36 }
  0x2e   :  { %456 = vmatprep.subr.msk.bf16.mxu0 %vm90_vm0, %v50_v37 }
  0x35   :  { %427 = vmatpush3.bf16.xpose.msra.mxu0 %v116_v40 }
  0x36   :  { %457 = vmatprep.subr.msk.bf16.mxu0 %vm90_vm0, %v51_v41 }
  0x3d   :  { %429 = vmatpush3.bf16.xpose.msra.mxu0 %v119_v42 }
  0x44   :  { %431 = vmatmul.mubr.msk.bf16.vlgmr.msra.gmra.mrb[0].mxu0 %vm90_vm0, %v466_v43 }
  0x84   :  { %v63_v46 = vpop.permute.xlu0 %62 }
  0x85   :  { %v73_v45 = vpop.permute.xlu1 %72 }
  0x88   :  { %v68_v53 = vpop.permute.xlu0 %67 }
  0x89   :  { %v78_v50 = vpop.permute.xlu1 %77 }
  0x8c   :  { %v199_v14 = vpop.permute.xlu0 %198 }
  0x8d   :  { %v204_v15 = vpop.permute.xlu1 %203 }
  0x90   :  { %v209_v16 = vpop.permute.xlu0 %208 }
  0x91   :  { %v214_v20 = vpop.permute.xlu1 %213 }
 0x117   :  { %v432_v47 = vpop.f32.mrb[0].mxu0 }
 0x118   :  { %v164_v48 = vadd.f32 %v432_v47, %v73_v45  ;;  %v155_v49 = vpop.f32.mrb[1].mxu0  ;;  %v302_v45 = vld [vmem:[%s690_s5] sm:$0xf]  ;;  %s518_s5 = smov [#allocation2]  }
 0x119   :  { %v156_v51 = vadd.f32 %v155_v49, %v63_v46  ;;  %v433_v52 = vpop.f32.mrb[2].mxu0  ;;  %v309_v46 = vpop.permute.xlu0 %308  ;;  %s380_s8 = sshll.u32 %s518_s5, 4  ;;  %s381_s8 = int_to_ptr.vmem [resolvable:$true] %s380_s8 }
 0x11a   :  { %v172_v54 = vmul.f32 0.5, %v164_v48  ;;  %v167_v55 = vadd.f32 %v433_v52, %v78_v50  ;;  %v158_v56 = vpop.f32.mrb[3].mxu0  ;;  %s491_s9 = scalar_lea.vmem %s381_s8, 128  ;;  %p496_p1 = scmp.lt.s32.totalorder %s381_s8, %s381_s8 }
 0x11b   :  { %v170_v57 = vmul.f32 0.5, %v156_v51  ;;  %v159_v58 = vadd.f32 %v158_v56, %v68_v53  ;;  %p492_p0 = scmp.ne.s32.totalorder %s381_s8, %s491_s9  ;;  %p497_p2 = scmp.lt.s32.totalorder %s491_s9, %s491_s9 }
 0x11c   :  { %469 = vtanh.f32 %v172_v54  ;;  %v173_v59 = vmul.f32 0.5, %v167_v55 }
 0x11d   :  { %471 = vtanh.f32 %v170_v57  ;;  %v171_v60 = vmul.f32 0.5, %v159_v58  ;;  %p498_p3 = por %p497_p2, %p496_p1 }
 0x11e   :  { %473 = vtanh.f32 %v173_v59 }
 0x11f   :  { %475 = vtanh.f32 %v171_v60  ;;  %p499_p4 = pnand %p498_p3, %p492_p0 }
 0x126   :  { %v470_v61 = vpop.eup %469 }
 0x127   :  { %v472_v62 = vpop.eup %471  ;;  %v180_v63 = vadd.f32 1.0, %v470_v61 }
 0x128   :  { %v474_v0 = vpop.eup %473  ;;  %v178_v1 = vadd.f32 1.0, %v472_v62 }
 0x129   :  { %v476_v2 = vpop.eup %475  ;;  %v181_v3 = vadd.f32 1.0, %v474_v0  ;;  %v184_v5 = vmul.f32 0.5, %v180_v63 }
 0x12a   :  { %v179_v4 = vadd.f32 1.0, %v476_v2  ;;  %v182_v7 = vmul.f32 0.5, %v178_v1 }
 0x12b   :  { %v185_v6 = vmul.f32 0.5, %v181_v3 }
 0x12c   :  { %v183_v8 = vmul.f32 0.5, %v179_v4 }
 0x12d   :  { %v191_v9 = vpack.c.bf16 %v185_v6, %v184_v5 }
 0x12e   :  { %v190_v10 = vpack.c.bf16 %v183_v8, %v182_v7 }
 0x12f   :  { %v235_v11 = vsel %vm233_vm2, %v191_v9, 0 }
 0x130   :  { %434 = vmatprep.subr.bf16.mxu1 %v190_v10 }
 0x131   :  { %435 = vmatpush3.bf16.msra.mxu1 %v190_v10 }
 0x132   :  { %458 = vmatprep.subr.msk.bf16.mxu1 %vm233_vm2, %v191_v9 }
 0x135   :  { %437 = vmatpush3.bf16.msra.mxu1 %v235_v11 }
 0x136   :  { %442 = vmatprep.subr.bf16.mxu1 %v516_v13 }
 0x138   :  { %439 = vmatmul.mubr.msk.bf16.vlgmr.msra.gmra.mrb[0].mxu1 %vm226_vm1, %v468_v12 }
 0x139   :  { %446 = vmatprep.mubr.msk.bf16.mxu1 %vm517_vm3, %v516_v13 }
 0x20b   :  { %v440_v17 = vpop.f32.mrb[0].mxu1 }
 0x20c   :  { %v280_v18 = vadd.f32 %v440_v17, %v209_v16  ;;  %v271_v19 = vpop.f32.mrb[1].mxu1 }
 0x20d   :  { %v272_v21 = vadd.f32 %v271_v19, %v199_v14  ;;  %v441_v22 = vpop.f32.mrb[2].mxu1 }
 0x20e   :  { %v288_v23 = vmul.f32 0.5, %v280_v18  ;;  %v283_v24 = vadd.f32 %v441_v22, %v214_v20  ;;  %v274_v25 = vpop.f32.mrb[3].mxu1 }
 0x20f   :  { %v286_v26 = vmul.f32 0.5, %v272_v21  ;;  %v275_v27 = vadd.f32 %v274_v25, %v204_v15 }
 0x210   :  { %477 = vtanh.f32 %v288_v23  ;;  %v289_v28 = vmul.f32 0.5, %v283_v24 }
 0x211   :  { %479 = vtanh.f32 %v286_v26  ;;  %v287_v29 = vmul.f32 0.5, %v275_v27 }
 0x212   :  { %481 = vtanh.f32 %v289_v28 }
 0x213   :  { %483 = vtanh.f32 %v287_v29 }
 0x21a   :  { %v478_v30 = vpop.eup %477 }
 0x21b   :  { %v480_v31 = vpop.eup %479  ;;  %v296_v32 = vadd.f32 1.0, %v478_v30 }
 0x21c   :  { %v482_v33 = vpop.eup %481  ;;  %v294_v34 = vadd.f32 1.0, %v480_v31 }
 0x21d   :  { %v484_v35 = vpop.eup %483  ;;  %v297_v36 = vadd.f32 1.0, %v482_v33  ;;  %v300_v38 = vmul.f32 0.5, %v296_v32 }
 0x21e   :  { %v295_v37 = vadd.f32 1.0, %v484_v35  ;;  %v298_v40 = vmul.f32 0.5, %v294_v34 }
 0x21f   :  { %v301_v39 = vmul.f32 0.5, %v297_v36 }
 0x220   :  { %v299_v41 = vmul.f32 0.5, %v295_v37 }
 0x221   :  { %v304_v42 = vpack.c.bf16 %v301_v39, %v300_v38 }
 0x222   :  { %v303_v43 = vpack.c.bf16 %v299_v41, %v298_v40 }
 0x223   :  { %v315_v44 = vsel %vm233_vm2, %v304_v42, 0 }
 0x224   :  { %443 = vmatpush3.bf16.msra.mxu1 %v303_v43 }
 0x225   :  { %444 = vmatprep.subr.bf16.mxu1 %v516_v13 }
 0x228   :  { %445 = vmatpush3.bf16.msra.mxu1 %v315_v44 }
 0x22b   :  { %447 = vmatmul.mubr.msk.bf16.vlgmr.msra.gmra.mrb[4].mxu1 %vm226_vm1, %v302_v45 }
 0x2fe   :  { %v351_v47 = vpop.f32.mrb[4].mxu1 }
 0x2ff   :  { %v352_v48 = vadd.f32 %v351_v47, %v309_v46  ;;  %v448_v49 = vpop.f32.mrb[5].mxu1 }
 0x300   :  { %v354_v50 = vpop.f32.mrb[6].mxu1 }
 0x301   :  { %v357_v51 = vmul.f32 0.5, %v352_v48  ;;  %v449_v52 = vpop.f32.mrb[7].mxu1 }
 0x303   :  { %485 = vtanh.f32 %v357_v51 }
 0x30d   :  { %v486_v53 = vpop.eup %485 }
 0x30e   :  { %v359_v54 = vadd.f32 1.0, %v486_v53 }
 0x310   :  { %v360_v55 = vmul.f32 0.5, %v359_v54 }
 0x312   :  { %v361_v56 = vmul.f32 1.442695, %v360_v55 }
 0x314   :  { %487 = vpow2.f32 %v361_v56 }
 0x31e   :  { %v488_v57 = vpop.eup %487 }
 0x31f   :  { %v364_v58 = vsel %vm363_vm4, %v488_v57, 0.0 }
 0x320   :  { %v365_v59 = vrot.slane %v364_v58, 4 }
 0x322   :  { %v366_v60 = vadd.f32 %v365_v59, %v364_v58 }
 0x324   :  { %v367_v61 = vrot.slane %v366_v60, 2 }
 0x326   :  { %v368_v62 = vadd.f32 %v367_v61, %v366_v60 }
 0x328   :  { %v369_v63 = vrot.slane %v368_v62, 1 }
 0x32a   :  { %v370_v0 = vadd.f32 %v369_v63, %v368_v62 }
 0x32c   :  { %489 = vrcp.f32 %v370_v0 }
 0x336   :  { %v490_v1 = vpop.eup %489 }
 0x337   :  { %v372_v2 = vmul.f32 %v490_v1, %v488_v57 }
 0x339   :  { %373 = vst [vmem:[#allocation2] sm:$0x7f] %v372_v2 }
 0x33a   :  { %502 = shalt.err (!%p499_p4)
}
 0x33b   :  { %s503_s12 = scalar_lea.hbm %s692_s7, 128 }
 0x33c   :  { %p504_p5 = scmp.ne.s32.totalorder %s692_s7, %s503_s12  ;;  %p507_p6 = scmp.lt.u32.totalorder %s503_s12, %s692_s7 }
 0x33e   :  { %p509_p7 = pnand %p507_p6, %p504_p5 }
 0x340   :  { %512 = shalt.err (!%p509_p7)
}
 0x341   :  { %383 = dma.vmem_to_hbm [thread:$0]  %s381_s8, 128, %s692_s7, [#allocation3]  }
 0x342   :  { %513 = dma.done.wait [#allocation3], 128  }
 0x343   :  { %514 = vsyncadd [#allocation3], 4294967168 }
 0x344   :  { %387 = vsyncpa [#allocation3], 1 }

</bundles_post_ra>
